<compile_context>
chip_gen: v6e
topology: v6e:2x2x1
jax: 0.10.0
libtpu: 0.0.40
codegen_flags: <defaults>
</compile_context>

<pallas_src>
import jax
import jax.numpy as jnp
from jax.experimental import pallas as pl
from jax.experimental.pallas import tpu as pltpu

EPS = 1e-5
LANES = 128
SUBLANES = 8


def _round_up(x, m):
    return (x + m - 1) // m * m


def _vmem_block_bytes(rows, cols, itemsize=4):
    """Padded (8, 128)-tiled VMEM footprint of a 2-D f32 block."""
    return _round_up(max(rows, 1), SUBLANES) * _round_up(max(cols, 1), LANES) * itemsize


def _scale_shift(s_ref, q_ref, g_ref, be_ref, inv_b):
    """Fold training-mode BN (biased var, eps) + affine into (scale, shift)."""
    mean = s_ref[...] * inv_b
    var = jnp.maximum(q_ref[...] * inv_b - mean * mean, 0.0)
    scale = g_ref[...] * jax.lax.rsqrt(var + EPS)
    shift = be_ref[...] - mean * scale
    return scale, shift


def _make_kernel(batch, tb, needs_mask):
    """batch = real (unpadded) batch size; tb = rows per tile (multiple of 8)."""
    inv_b = 1.0 / float(batch)

    def kernel(x_ref,
               w1_ref, g1_ref, be1_ref,
               w2_ref, g2_ref, be2_ref,
               w3_ref, g3_ref, be3_ref,
               w4_ref, b4_ref,
               o_ref,
               stash_a, stash_b,
               s1, q1, s2, q2, s3, q3,
               sc1, sh1, sc2, sh2, sc3, sh3):
        p = pl.program_id(0)                       # phase 0..3 (outer, sequential)
        i = pl.program_id(1)                       # batch tile (inner)
        row0 = pl.multiple_of(i * tb, SUBLANES)
        rows = pl.ds(row0, tb)

        @pl.when(jnp.logical_and(p == 0, i == 0))
        def _init_stats():
            for r in (s1, q1, s2, q2, s3, q3):
                r[...] = jnp.zeros_like(r)

        if needs_mask:
            ridx = jax.lax.broadcasted_iota(jnp.int32, (tb, 1), 0) + i * tb
            valid = (ridx < batch).astype(jnp.float32)     # (tb, 1), built once
        else:
            valid = None

        def _mask_rows(v):
            # Zero padded batch rows (post-BN they would be relu(shift) != 0).
            return v if valid is None else v * valid

        # ---- phase 0: layer-1 matmul, stash h1, accumulate its stats --------
        @pl.when(p == 0)
        def _phase0():
            # Padded X rows are exact zeros; with the bias dropped they add
            # exact zeros to the statistics, so no mask is needed here.
            h1 = jnp.dot(x_ref[...], w1_ref[...],
                         preferred_element_type=jnp.float32)
            stash_a[rows, :] = h1
            s1[...] += jnp.sum(h1, axis=0, keepdims=True)
            q1[...] += jnp.sum(h1 * h1, axis=0, keepdims=True)

        # ---- phase 1: BN1+ReLU from stash, layer-2 matmul, stash h2 ---------
        @pl.when(p == 1)
        def _phase1():
            @pl.when(i == 0)
            def _():
                sc, sh = _scale_shift(s1, q1, g1_ref, be1_ref, inv_b)
                sc1[...] = sc
                sh1[...] = sh
            h1 = stash_a[rows, :]
            a1 = _mask_rows(jnp.maximum(h1 * sc1[...] + sh1[...], 0.0))
            h2 = jnp.dot(a1, w2_ref[...], preferred_element_type=jnp.float32)
            stash_b[rows, :] = h2
            s2[...] += jnp.sum(h2, axis=0, keepdims=True)
            q2[...] += jnp.sum(h2 * h2, axis=0, keepdims=True)

        # ---- phase 2: BN2+ReLU, layer-3 matmul, stash h3 (reuses stash_a) ---
        @pl.when(p == 2)
        def _phase2():
            @pl.when(i == 0)
            def _():
                sc, sh = _scale_shift(s2, q2, g2_ref, be2_ref, inv_b)
                sc2[...] = sc
                sh2[...] = sh
            h2 = stash_b[rows, :]
            a2 = _mask_rows(jnp.maximum(h2 * sc2[...] + sh2[...], 0.0))
            h3 = jnp.dot(a2, w3_ref[...], preferred_element_type=jnp.float32)
            stash_a[rows, :] = h3          # h1 no longer needed -> reuse
            s3[...] += jnp.sum(h3, axis=0, keepdims=True)
            q3[...] += jnp.sum(h3 * h3, axis=0, keepdims=True)

        # ---- phase 3: BN3+ReLU, output head (only phase that writes o_ref) --
        @pl.when(p == 3)
        def _phase3():
            @pl.when(i == 0)
            def _():
                sc, sh = _scale_shift(s3, q3, g3_ref, be3_ref, inv_b)
                sc3[...] = sc
                sh3[...] = sh
            h3 = stash_a[rows, :]
            a3 = jnp.maximum(h3 * sc3[...] + sh3[...], 0.0)
            o_ref[...] = (jnp.dot(a3, w4_ref[...],
                                  preferred_element_type=jnp.float32)
                          + b4_ref[...])

    return kernel


def mlp_regressor_forward(x, params, *, block_b=2048):
    """x: (B, input_size) float32; params: dict (see init_params)."""
    batch, in_f = x.shape
    d1 = params["w1"].shape[1]          # hidden
    d2 = params["w2"].shape[1]          # 2 * hidden
    d3 = params["w3"].shape[1]          # hidden
    out_f = params["w4"].shape[1]       # 2
    if d3 != d1:
        raise ValueError("stash reuse assumes linear3 width == linear1 width "
                         "(always true for MLP_Regressor)")

    # Batch tiling: tile rows multiple of 8; batch padded to n_tiles * tb.
    tb = min(_round_up(block_b, SUBLANES), _round_up(batch, SUBLANES))
    b_pad = _round_up(batch, tb)
    n_tiles = b_pad // tb
    needs_mask = b_pad != batch
    if needs_mask:
        x = jnp.pad(x, ((0, b_pad - batch), (0, 0)))

    weights = (
        params["w1"], params["g1"], params["be1"],
        params["w2"], params["g2"], params["be2"],
        params["w3"], params["g3"], params["be3"],
        params["w4"], params["b4"],
    )

    # ---- VMEM budgeting: the activation stash must stay on-chip -------------
    stash_bytes = _vmem_block_bytes(b_pad, d1) + _vmem_block_bytes(b_pad, d2)
    small_bytes = sum(_vmem_block_bytes(1, d)
                      for d in (d1, d1, d2, d2, d3, d3) * 2)
    weight_bytes = 2 * sum(_vmem_block_bytes(*w.shape) for w in weights)
    pipe_bytes = 2 * (_vmem_block_bytes(tb, in_f) + _vmem_block_bytes(tb, out_f))
    vmem_needed = stash_bytes + small_bytes + weight_bytes + pipe_bytes + (2 << 20)

    try:
        vmem_cap = int(pltpu.get_tpu_info().vmem_capacity_bytes)
    except Exception:
        vmem_cap = 64 << 20              # conservative: v7x per-TensorCore VMEM
    budget = vmem_cap * 3 // 4
    if vmem_needed > budget:
        # TODO(synk): for batches this large, stream the activation stash
        # through HBM with manual double-buffered make_async_copy instead.
        raise ValueError(
            f"batch={batch}: VMEM activation stash needs ~{vmem_needed >> 20} MiB "
            f"(> {budget >> 20} MiB budget on this chip).")
    vmem_limit = max(vmem_needed, 32 << 20)

    # ---- specs ---------------------------------------------------------------
    x_map = lambda p, i: (jnp.where(p == 0, i, 0), 0)   # X streamed once  # noqa: E731
    o_map = lambda p, i: (jnp.where(p == 3, i, 0), 0)   # write only in p3 # noqa: E731
    w_map = lambda p, i: (0, 0)                         # VMEM-resident    # noqa: E731

    in_specs = [pl.BlockSpec((tb, in_f), x_map)]
    in_specs += [pl.BlockSpec(w.shape, w_map) for w in weights]

    grid_spec = pltpu.PrefetchScalarGridSpec(
        num_scalar_prefetch=0,
        grid=(4, n_tiles),                # (phase, batch tile); phase outer
        in_specs=in_specs,
        out_specs=pl.BlockSpec((tb, out_f), o_map),
        scratch_shapes=[
            pltpu.VMEM((b_pad, d1), jnp.float32),   # stash_a: h1, then h3
            pltpu.VMEM((b_pad, d2), jnp.float32),   # stash_b: h2
            # BN sum / sum-of-squares accumulators (s1,q1,s2,q2,s3,q3)
            pltpu.VMEM((1, d1), jnp.float32), pltpu.VMEM((1, d1), jnp.float32),
            pltpu.VMEM((1, d2), jnp.float32), pltpu.VMEM((1, d2), jnp.float32),
            pltpu.VMEM((1, d3), jnp.float32), pltpu.VMEM((1, d3), jnp.float32),
            # folded BN scale / shift (sc1,sh1,sc2,sh2,sc3,sh3)
            pltpu.VMEM((1, d1), jnp.float32), pltpu.VMEM((1, d1), jnp.float32),
            pltpu.VMEM((1, d2), jnp.float32), pltpu.VMEM((1, d2), jnp.float32),
            pltpu.VMEM((1, d3), jnp.float32), pltpu.VMEM((1, d3), jnp.float32),
        ],
    )

    out = pl.pallas_call(
        _make_kernel(batch, tb, needs_mask),
        grid_spec=grid_spec,
        out_shape=jax.ShapeDtypeStruct((b_pad, out_f), jnp.float32),
        compiler_params=pltpu.CompilerParams(
            # Both axes carry cross-step state (stat accumulation, phase order,
            # scale/shift computed at tile 0) -> sequential on one core.
            # TODO(synk): v7x megacore split of the tile axis + CMEM stat reduce.
            dimension_semantics=("arbitrary", "arbitrary"),
            vmem_limit_bytes=int(vmem_limit),
        ),
    )(x, *weights)

    return out[:batch, :out_f]


def init_params(key, input_size, hidden_size=32):
    """nn.Linear-style U(-1/sqrt(fan_in), 1/sqrt(fan_in)) init; BN gamma=1, beta=0.
    b1..b3 exist only for the reference (the kernel drops them exactly)."""
    dims = [
        (input_size, hidden_size),
        (hidden_size, 2 * hidden_size),
        (2 * hidden_size, hidden_size),
        (hidden_size, 2),
    ]
    params = {}
    keys = jax.random.split(key, 2 * len(dims))
    for i, (fan_in, fan_out) in enumerate(dims, start=1):
        bound = 1.0 / jnp.sqrt(jnp.float32(fan_in))
        params[f"w{i}"] = jax.random.uniform(
            keys[2 * (i - 1)], (fan_in, fan_out), jnp.float32, -bound, bound)
        params[f"b{i}"] = jax.random.uniform(
            keys[2 * (i - 1) + 1], (1, fan_out), jnp.float32, -bound, bound)
        if i < 4:
            params[f"g{i}"] = jnp.ones((1, fan_out), jnp.float32)
            params[f"be{i}"] = jnp.zeros((1, fan_out), jnp.float32)
    return params


def reference_forward(x, params):
    """Pure-JAX reference matching the PyTorch module (keeps pre-BN biases,
    two-pass variance)."""
    h = x
    for i in range(1, 4):
        h = h @ params[f"w{i}"] + params[f"b{i}"]
        mean = jnp.mean(h, axis=0, keepdims=True)
        var = jnp.mean((h - mean) ** 2, axis=0, keepdims=True)
        h = (h - mean) / jnp.sqrt(var + EPS)
        h = jnp.maximum(h * params[f"g{i}"] + params[f"be{i}"], 0.0)
    return h @ params["w4"] + params["b4"]


if __name__ == "__main__":
    key = jax.random.PRNGKey(0)
    k_x, k_p, k_x2 = jax.random.split(key, 3)

    input_size, hidden_size = 16, 32
    params = init_params(k_p, input_size, hidden_size)

    # Case 1: tiny batch -> single tile, no padding, default (large) tile size.
    batch = 8
    x = jax.random.normal(k_x, (batch, input_size), jnp.float32)
    out = jax.block_until_ready(mlp_regressor_forward(x, params))
    ref = reference_forward(x, params)
    assert out.shape == (batch, 2)
    assert jnp.allclose(out, ref, atol=1e-4, rtol=1e-4), "mismatch (small batch)"

    # Case 2: multi-tile batch with padding -> exercises the VMEM activation
    # stash across tiles, global-batch BN statistics, and the row-validity mask.
    batch2 = 300
    x2 = jax.random.normal(k_x2, (batch2, input_size), jnp.float32)
    out2 = jax.block_until_ready(mlp_regressor_forward(x2, params, block_b=128))
    ref2 = reference_forward(x2, params)
    assert out2.shape == (batch2, 2)
    assert jnp.allclose(out2, ref2, atol=1e-4, rtol=1e-4), "mismatch (tiled batch)"

    print("KERNEL_OK")
</pallas_src>

<mosaic_0001>
module attributes {stable_mosaic.version = 11 : i64} {
  func.func @kernel(%arg0: i32, %arg1: i32, %arg2: memref<8x16xf32, #tpu.memory_space<vmem>>, %arg3: memref<16x32xf32, #tpu.memory_space<vmem>>, %arg4: memref<1x32xf32, #tpu.memory_space<vmem>>, %arg5: memref<1x32xf32, #tpu.memory_space<vmem>>, %arg6: memref<32x64xf32, #tpu.memory_space<vmem>>, %arg7: memref<1x64xf32, #tpu.memory_space<vmem>>, %arg8: memref<1x64xf32, #tpu.memory_space<vmem>>, %arg9: memref<64x32xf32, #tpu.memory_space<vmem>>, %arg10: memref<1x32xf32, #tpu.memory_space<vmem>>, %arg11: memref<1x32xf32, #tpu.memory_space<vmem>>, %arg12: memref<32x2xf32, #tpu.memory_space<vmem>>, %arg13: memref<1x2xf32, #tpu.memory_space<vmem>>, %arg14: memref<8x2xf32, #tpu.memory_space<vmem>>, %arg15: memref<8x32xf32, #tpu.memory_space<vmem>>, %arg16: memref<8x64xf32, #tpu.memory_space<vmem>>, %arg17: memref<1x32xf32, #tpu.memory_space<vmem>>, %arg18: memref<1x32xf32, #tpu.memory_space<vmem>>, %arg19: memref<1x64xf32, #tpu.memory_space<vmem>>, %arg20: memref<1x64xf32, #tpu.memory_space<vmem>>, %arg21: memref<1x32xf32, #tpu.memory_space<vmem>>, %arg22: memref<1x32xf32, #tpu.memory_space<vmem>>, %arg23: memref<1x32xf32, #tpu.memory_space<vmem>>, %arg24: memref<1x32xf32, #tpu.memory_space<vmem>>, %arg25: memref<1x64xf32, #tpu.memory_space<vmem>>, %arg26: memref<1x64xf32, #tpu.memory_space<vmem>>, %arg27: memref<1x32xf32, #tpu.memory_space<vmem>>, %arg28: memref<1x32xf32, #tpu.memory_space<vmem>>) attributes {dimension_semantics = [#tpu.dimension_semantics<arbitrary>, #tpu.dimension_semantics<arbitrary>], iteration_bounds = array<i64: 4, 1>, scalar_prefetch = 0 : i64, scratch_operands = 14 : i64, tpu.core_type = #tpu.core_type<tc>, window_params = [{transform_indices = @transform_0, window_bounds = array<i64: 8, 16>}, {pipeline_mode = #tpu.pipeline_mode<synchronous>, transform_indices = @transform_1, window_bounds = array<i64: 16, 32>}, {pipeline_mode = #tpu.pipeline_mode<synchronous>, transform_indices = @transform_2, window_bounds = array<i64: 1, 32>}, {pipeline_mode = #tpu.pipeline_mode<synchronous>, transform_indices = @transform_3, window_bounds = array<i64: 1, 32>}, {pipeline_mode = #tpu.pipeline_mode<synchronous>, transform_indices = @transform_4, window_bounds = array<i64: 32, 64>}, {pipeline_mode = #tpu.pipeline_mode<synchronous>, transform_indices = @transform_5, window_bounds = array<i64: 1, 64>}, {pipeline_mode = #tpu.pipeline_mode<synchronous>, transform_indices = @transform_6, window_bounds = array<i64: 1, 64>}, {pipeline_mode = #tpu.pipeline_mode<synchronous>, transform_indices = @transform_7, window_bounds = array<i64: 64, 32>}, {pipeline_mode = #tpu.pipeline_mode<synchronous>, transform_indices = @transform_8, window_bounds = array<i64: 1, 32>}, {pipeline_mode = #tpu.pipeline_mode<synchronous>, transform_indices = @transform_9, window_bounds = array<i64: 1, 32>}, {pipeline_mode = #tpu.pipeline_mode<synchronous>, transform_indices = @transform_10, window_bounds = array<i64: 32, 2>}, {pipeline_mode = #tpu.pipeline_mode<synchronous>, transform_indices = @transform_11, window_bounds = array<i64: 1, 2>}, {transform_indices = @transform_12, window_bounds = array<i64: 8, 2>}]} {
    %c8_i32 = arith.constant 8 : i32
    %0 = arith.muli %arg1, %c8_i32 : i32
    %1 = tpu.assume_multiple %0, 8 : i32
    %c0_i32 = arith.constant 0 : i32
    %2 = arith.cmpi eq, %arg0, %c0_i32 : i32
    %c0_i32_0 = arith.constant 0 : i32
    %3 = arith.cmpi eq, %arg1, %c0_i32_0 : i32
    %4 = arith.andi %2, %3 : i1
    %5 = arith.extui %4 : i1 to i32
    %c0_i32_1 = arith.constant 0 : i32
    %6 = arith.cmpi ne, %5, %c0_i32_1 : i32
    scf.if %6 {
      %cst = arith.constant 0.000000e+00 : f32
      %19 = vector.broadcast %cst : f32 to vector<1x32xf32>
      %c0 = arith.constant 0 : index
      %c0_7 = arith.constant 0 : index
      %20 = vector.load %arg17[%c0, %c0_7] : memref<1x32xf32, #tpu.memory_space<vmem>>, vector<1x32xf32>
      tpu.vector_store %arg17[%c0, %c0_7], %19 {strides = array<i32>} : memref<1x32xf32, #tpu.memory_space<vmem>>, vector<1x32xf32>,
      %cst_8 = arith.constant 0.000000e+00 : f32
      %21 = vector.broadcast %cst_8 : f32 to vector<1x32xf32>
      %c0_9 = arith.constant 0 : index
      %c0_10 = arith.constant 0 : index
      %22 = vector.load %arg18[%c0_9, %c0_10] : memref<1x32xf32, #tpu.memory_space<vmem>>, vector<1x32xf32>
      tpu.vector_store %arg18[%c0_9, %c0_10], %21 {strides = array<i32>} : memref<1x32xf32, #tpu.memory_space<vmem>>, vector<1x32xf32>,
      %cst_11 = arith.constant 0.000000e+00 : f32
      %23 = vector.broadcast %cst_11 : f32 to vector<1x64xf32>
      %c0_12 = arith.constant 0 : index
      %c0_13 = arith.constant 0 : index
      %24 = vector.load %arg19[%c0_12, %c0_13] : memref<1x64xf32, #tpu.memory_space<vmem>>, vector<1x64xf32>
      tpu.vector_store %arg19[%c0_12, %c0_13], %23 {strides = array<i32>} : memref<1x64xf32, #tpu.memory_space<vmem>>, vector<1x64xf32>,
      %cst_14 = arith.constant 0.000000e+00 : f32
      %25 = vector.broadcast %cst_14 : f32 to vector<1x64xf32>
      %c0_15 = arith.constant 0 : index
      %c0_16 = arith.constant 0 : index
      %26 = vector.load %arg20[%c0_15, %c0_16] : memref<1x64xf32, #tpu.memory_space<vmem>>, vector<1x64xf32>
      tpu.vector_store %arg20[%c0_15, %c0_16], %25 {strides = array<i32>} : memref<1x64xf32, #tpu.memory_space<vmem>>, vector<1x64xf32>,
      %cst_17 = arith.constant 0.000000e+00 : f32
      %27 = vector.broadcast %cst_17 : f32 to vector<1x32xf32>
      %c0_18 = arith.constant 0 : index
      %c0_19 = arith.constant 0 : index
      %28 = vector.load %arg21[%c0_18, %c0_19] : memref<1x32xf32, #tpu.memory_space<vmem>>, vector<1x32xf32>
      tpu.vector_store %arg21[%c0_18, %c0_19], %27 {strides = array<i32>} : memref<1x32xf32, #tpu.memory_space<vmem>>, vector<1x32xf32>,
      %cst_20 = arith.constant 0.000000e+00 : f32
      %29 = vector.broadcast %cst_20 : f32 to vector<1x32xf32>
      %c0_21 = arith.constant 0 : index
      %c0_22 = arith.constant 0 : index
      %30 = vector.load %arg22[%c0_21, %c0_22] : memref<1x32xf32, #tpu.memory_space<vmem>>, vector<1x32xf32>
      tpu.vector_store %arg22[%c0_21, %c0_22], %29 {strides = array<i32>} : memref<1x32xf32, #tpu.memory_space<vmem>>, vector<1x32xf32>,
    } else {
    }
    %c0_i32_2 = arith.constant 0 : i32
    %7 = arith.cmpi eq, %arg0, %c0_i32_2 : i32
    %8 = arith.extui %7 : i1 to i32
    %c0_i32_3 = arith.constant 0 : i32
    %9 = arith.cmpi ne, %8, %c0_i32_3 : i32
    scf.if %9 {
      %c0 = arith.constant 0 : index
      %c0_7 = arith.constant 0 : index
      %19 = vector.load %arg2[%c0, %c0_7] : memref<8x16xf32, #tpu.memory_space<vmem>>, vector<8x16xf32>
      %c0_8 = arith.constant 0 : index
      %c0_9 = arith.constant 0 : index
      %20 = vector.load %arg3[%c0_8, %c0_9] : memref<16x32xf32, #tpu.memory_space<vmem>>, vector<16x32xf32>
      %cst = arith.constant dense<0.000000e+00> : vector<8x32xf32>
      %21 = tpu.matmul %19, %20, %cst {dimension_numbers = #tpu.dot_dimension_numbers<[1], [0], [0], [1], [0, 0, 1, 1], [], []>} : vector<8x16xf32>, vector<16x32xf32>, vector<8x32xf32> -> vector<8x32xf32>
      %22 = arith.index_cast %1 : i32 to index
      %c0_10 = arith.constant 0 : index
      %23 = vector.load %arg15[%22, %c0_10] : memref<8x32xf32, #tpu.memory_space<vmem>>, vector<8x32xf32>
      tpu.vector_store %arg15[%22, %c0_10], %21 {strides = array<i32>} : memref<8x32xf32, #tpu.memory_space<vmem>>, vector<8x32xf32>,
      %c0_11 = arith.constant 0 : index
      %c0_12 = arith.constant 0 : index
      %24 = vector.load %arg17[%c0_11, %c0_12] : memref<1x32xf32, #tpu.memory_space<vmem>>, vector<1x32xf32>
      %cst_13 = arith.constant dense<0.000000e+00> : vector<32xf32>
      %25 = vector.multi_reduction <add>, %21, %cst_13 [0] : vector<8x32xf32> to vector<32xf32>
      %26 = vector.shape_cast %25 : vector<32xf32> to vector<1x32xf32>
      %27 = arith.addf %24, %26 : vector<1x32xf32>
      %c0_14 = arith.constant 0 : index
      %c0_15 = arith.constant 0 : index
      %28 = vector.load %arg17[%c0_14, %c0_15] : memref<1x32xf32, #tpu.memory_space<vmem>>, vector<1x32xf32>
      tpu.vector_store %arg17[%c0_14, %c0_15], %27 {strides = array<i32>} : memref<1x32xf32, #tpu.memory_space<vmem>>, vector<1x32xf32>,
      %c0_16 = arith.constant 0 : index
      %c0_17 = arith.constant 0 : index
      %29 = vector.load %arg18[%c0_16, %c0_17] : memref<1x32xf32, #tpu.memory_space<vmem>>, vector<1x32xf32>
      %30 = arith.mulf %21, %21 : vector<8x32xf32>
      %cst_18 = arith.constant dense<0.000000e+00> : vector<32xf32>
      %31 = vector.multi_reduction <add>, %30, %cst_18 [0] : vector<8x32xf32> to vector<32xf32>
      %32 = vector.shape_cast %31 : vector<32xf32> to vector<1x32xf32>
      %33 = arith.addf %29, %32 : vector<1x32xf32>
      %c0_19 = arith.constant 0 : index
      %c0_20 = arith.constant 0 : index
      %34 = vector.load %arg18[%c0_19, %c0_20] : memref<1x32xf32, #tpu.memory_space<vmem>>, vector<1x32xf32>
      tpu.vector_store %arg18[%c0_19, %c0_20], %33 {strides = array<i32>} : memref<1x32xf32, #tpu.memory_space<vmem>>, vector<1x32xf32>,
    } else {
    }
    %c1_i32 = arith.constant 1 : i32
    %10 = arith.cmpi eq, %arg0, %c1_i32 : i32
    %11 = arith.extui %10 : i1 to i32
    %c0_i32_4 = arith.constant 0 : i32
    %12 = arith.cmpi ne, %11, %c0_i32_4 : i32
    scf.if %12 {
      %c0_i32_7 = arith.constant 0 : i32
      %19 = arith.cmpi eq, %arg1, %c0_i32_7 : i32
      %20 = arith.extui %19 : i1 to i32
      %c0_i32_8 = arith.constant 0 : i32
      %21 = arith.cmpi ne, %20, %c0_i32_8 : i32
      scf.if %21 {
        %c0_27 = arith.constant 0 : index
        %c0_28 = arith.constant 0 : index
        %47 = vector.load %arg17[%c0_27, %c0_28] : memref<1x32xf32, #tpu.memory_space<vmem>>, vector<1x32xf32>
        %cst_29 = arith.constant 1.250000e-01 : f32
        %48 = vector.broadcast %cst_29 : f32 to vector<1x32xf32>
        %49 = arith.mulf %47, %48 : vector<1x32xf32>
        %c0_30 = arith.constant 0 : index
        %c0_31 = arith.constant 0 : index
        %50 = vector.load %arg18[%c0_30, %c0_31] : memref<1x32xf32, #tpu.memory_space<vmem>>, vector<1x32xf32>
        %cst_32 = arith.constant 1.250000e-01 : f32
        %51 = vector.broadcast %cst_32 : f32 to vector<1x32xf32>
        %52 = arith.mulf %50, %51 : vector<1x32xf32>
        %53 = arith.mulf %49, %49 : vector<1x32xf32>
        %54 = arith.subf %52, %53 : vector<1x32xf32>
        %cst_33 = arith.constant 0.000000e+00 : f32
        %55 = vector.broadcast %cst_33 : f32 to vector<1x32xf32>
        %56 = arith.maximumf %54, %55 : vector<1x32xf32>
        %c0_34 = arith.constant 0 : index
        %c0_35 = arith.constant 0 : index
        %57 = vector.load %arg4[%c0_34, %c0_35] : memref<1x32xf32, #tpu.memory_space<vmem>>, vector<1x32xf32>
        %cst_36 = arith.constant 9.99999974E-6 : f32
        %58 = vector.broadcast %cst_36 : f32 to vector<1x32xf32>
        %59 = arith.addf %56, %58 : vector<1x32xf32>
        %60 = math.rsqrt %59 : vector<1x32xf32>
        %61 = arith.mulf %57, %60 : vector<1x32xf32>
        %c0_37 = arith.constant 0 : index
        %c0_38 = arith.constant 0 : index
        %62 = vector.load %arg5[%c0_37, %c0_38] : memref<1x32xf32, #tpu.memory_space<vmem>>, vector<1x32xf32>
        %63 = arith.mulf %49, %61 : vector<1x32xf32>
        %64 = arith.subf %62, %63 : vector<1x32xf32>
        %c0_39 = arith.constant 0 : index
        %c0_40 = arith.constant 0 : index
        %65 = vector.load %arg23[%c0_39, %c0_40] : memref<1x32xf32, #tpu.memory_space<vmem>>, vector<1x32xf32>
        tpu.vector_store %arg23[%c0_39, %c0_40], %61 {strides = array<i32>} : memref<1x32xf32, #tpu.memory_space<vmem>>, vector<1x32xf32>,
        %c0_41 = arith.constant 0 : index
        %c0_42 = arith.constant 0 : index
        %66 = vector.load %arg24[%c0_41, %c0_42] : memref<1x32xf32, #tpu.memory_space<vmem>>, vector<1x32xf32>
        tpu.vector_store %arg24[%c0_41, %c0_42], %64 {strides = array<i32>} : memref<1x32xf32, #tpu.memory_space<vmem>>, vector<1x32xf32>,
      } else {
      }
      %22 = arith.index_cast %1 : i32 to index
      %c0 = arith.constant 0 : index
      %23 = vector.load %arg15[%22, %c0] : memref<8x32xf32, #tpu.memory_space<vmem>>, vector<8x32xf32>
      %c0_9 = arith.constant 0 : index
      %c0_10 = arith.constant 0 : index
      %24 = vector.load %arg23[%c0_9, %c0_10] : memref<1x32xf32, #tpu.memory_space<vmem>>, vector<1x32xf32>
      %25 = vector.broadcast %24 : vector<1x32xf32> to vector<8x32xf32>
      %26 = arith.mulf %23, %25 : vector<8x32xf32>
      %c0_11 = arith.constant 0 : index
      %c0_12 = arith.constant 0 : index
      %27 = vector.load %arg24[%c0_11, %c0_12] : memref<1x32xf32, #tpu.memory_space<vmem>>, vector<1x32xf32>
      %28 = vector.broadcast %27 : vector<1x32xf32> to vector<8x32xf32>
      %29 = arith.addf %26, %28 : vector<8x32xf32>
      %cst = arith.constant 0.000000e+00 : f32
      %30 = vector.broadcast %cst : f32 to vector<8x32xf32>
      %31 = arith.maximumf %29, %30 : vector<8x32xf32>
      %c0_13 = arith.constant 0 : index
      %c0_14 = arith.constant 0 : index
      %32 = vector.load %arg6[%c0_13, %c0_14] : memref<32x64xf32, #tpu.memory_space<vmem>>, vector<32x64xf32>
      %cst_15 = arith.constant dense<0.000000e+00> : vector<8x64xf32>
      %33 = tpu.matmul %31, %32, %cst_15 {dimension_numbers = #tpu.dot_dimension_numbers<[1], [0], [0], [1], [0, 0, 1, 1], [], []>} : vector<8x32xf32>, vector<32x64xf32>, vector<8x64xf32> -> vector<8x64xf32>
      %34 = arith.index_cast %1 : i32 to index
      %c0_16 = arith.constant 0 : index
      %35 = vector.load %arg16[%34, %c0_16] : memref<8x64xf32, #tpu.memory_space<vmem>>, vector<8x64xf32>
      tpu.vector_store %arg16[%34, %c0_16], %33 {strides = array<i32>} : memref<8x64xf32, #tpu.memory_space<vmem>>, vector<8x64xf32>,
      %c0_17 = arith.constant 0 : index
      %c0_18 = arith.constant 0 : index
      %36 = vector.load %arg19[%c0_17, %c0_18] : memref<1x64xf32, #tpu.memory_space<vmem>>, vector<1x64xf32>
      %cst_19 = arith.constant dense<0.000000e+00> : vector<64xf32>
      %37 = vector.multi_reduction <add>, %33, %cst_19 [0] : vector<8x64xf32> to vector<64xf32>
      %38 = vector.shape_cast %37 : vector<64xf32> to vector<1x64xf32>
      %39 = arith.addf %36, %38 : vector<1x64xf32>
      %c0_20 = arith.constant 0 : index
      %c0_21 = arith.constant 0 : index
      %40 = vector.load %arg19[%c0_20, %c0_21] : memref<1x64xf32, #tpu.memory_space<vmem>>, vector<1x64xf32>
      tpu.vector_store %arg19[%c0_20, %c0_21], %39 {strides = array<i32>} : memref<1x64xf32, #tpu.memory_space<vmem>>, vector<1x64xf32>,
      %c0_22 = arith.constant 0 : index
      %c0_23 = arith.constant 0 : index
      %41 = vector.load %arg20[%c0_22, %c0_23] : memref<1x64xf32, #tpu.memory_space<vmem>>, vector<1x64xf32>
      %42 = arith.mulf %33, %33 : vector<8x64xf32>
      %cst_24 = arith.constant dense<0.000000e+00> : vector<64xf32>
      %43 = vector.multi_reduction <add>, %42, %cst_24 [0] : vector<8x64xf32> to vector<64xf32>
      %44 = vector.shape_cast %43 : vector<64xf32> to vector<1x64xf32>
      %45 = arith.addf %41, %44 : vector<1x64xf32>
      %c0_25 = arith.constant 0 : index
      %c0_26 = arith.constant 0 : index
      %46 = vector.load %arg20[%c0_25, %c0_26] : memref<1x64xf32, #tpu.memory_space<vmem>>, vector<1x64xf32>
      tpu.vector_store %arg20[%c0_25, %c0_26], %45 {strides = array<i32>} : memref<1x64xf32, #tpu.memory_space<vmem>>, vector<1x64xf32>,
    } else {
    }
    %c2_i32 = arith.constant 2 : i32
    %13 = arith.cmpi eq, %arg0, %c2_i32 : i32
    %14 = arith.extui %13 : i1 to i32
    %c0_i32_5 = arith.constant 0 : i32
    %15 = arith.cmpi ne, %14, %c0_i32_5 : i32
    scf.if %15 {
      %c0_i32_7 = arith.constant 0 : i32
      %19 = arith.cmpi eq, %arg1, %c0_i32_7 : i32
      %20 = arith.extui %19 : i1 to i32
      %c0_i32_8 = arith.constant 0 : i32
      %21 = arith.cmpi ne, %20, %c0_i32_8 : i32
      scf.if %21 {
        %c0_27 = arith.constant 0 : index
        %c0_28 = arith.constant 0 : index
        %47 = vector.load %arg19[%c0_27, %c0_28] : memref<1x64xf32, #tpu.memory_space<vmem>>, vector<1x64xf32>
        %cst_29 = arith.constant 1.250000e-01 : f32
        %48 = vector.broadcast %cst_29 : f32 to vector<1x64xf32>
        %49 = arith.mulf %47, %48 : vector<1x64xf32>
        %c0_30 = arith.constant 0 : index
        %c0_31 = arith.constant 0 : index
        %50 = vector.load %arg20[%c0_30, %c0_31] : memref<1x64xf32, #tpu.memory_space<vmem>>, vector<1x64xf32>
        %cst_32 = arith.constant 1.250000e-01 : f32
        %51 = vector.broadcast %cst_32 : f32 to vector<1x64xf32>
        %52 = arith.mulf %50, %51 : vector<1x64xf32>
        %53 = arith.mulf %49, %49 : vector<1x64xf32>
        %54 = arith.subf %52, %53 : vector<1x64xf32>
        %cst_33 = arith.constant 0.000000e+00 : f32
        %55 = vector.broadcast %cst_33 : f32 to vector<1x64xf32>
        %56 = arith.maximumf %54, %55 : vector<1x64xf32>
        %c0_34 = arith.constant 0 : index
        %c0_35 = arith.constant 0 : index
        %57 = vector.load %arg7[%c0_34, %c0_35] : memref<1x64xf32, #tpu.memory_space<vmem>>, vector<1x64xf32>
        %cst_36 = arith.constant 9.99999974E-6 : f32
        %58 = vector.broadcast %cst_36 : f32 to vector<1x64xf32>
        %59 = arith.addf %56, %58 : vector<1x64xf32>
        %60 = math.rsqrt %59 : vector<1x64xf32>
        %61 = arith.mulf %57, %60 : vector<1x64xf32>
        %c0_37 = arith.constant 0 : index
        %c0_38 = arith.constant 0 : index
        %62 = vector.load %arg8[%c0_37, %c0_38] : memref<1x64xf32, #tpu.memory_space<vmem>>, vector<1x64xf32>
        %63 = arith.mulf %49, %61 : vector<1x64xf32>
        %64 = arith.subf %62, %63 : vector<1x64xf32>
        %c0_39 = arith.constant 0 : index
        %c0_40 = arith.constant 0 : index
        %65 = vector.load %arg25[%c0_39, %c0_40] : memref<1x64xf32, #tpu.memory_space<vmem>>, vector<1x64xf32>
        tpu.vector_store %arg25[%c0_39, %c0_40], %61 {strides = array<i32>} : memref<1x64xf32, #tpu.memory_space<vmem>>, vector<1x64xf32>,
        %c0_41 = arith.constant 0 : index
        %c0_42 = arith.constant 0 : index
        %66 = vector.load %arg26[%c0_41, %c0_42] : memref<1x64xf32, #tpu.memory_space<vmem>>, vector<1x64xf32>
        tpu.vector_store %arg26[%c0_41, %c0_42], %64 {strides = array<i32>} : memref<1x64xf32, #tpu.memory_space<vmem>>, vector<1x64xf32>,
      } else {
      }
      %22 = arith.index_cast %1 : i32 to index
      %c0 = arith.constant 0 : index
      %23 = vector.load %arg16[%22, %c0] : memref<8x64xf32, #tpu.memory_space<vmem>>, vector<8x64xf32>
      %c0_9 = arith.constant 0 : index
      %c0_10 = arith.constant 0 : index
      %24 = vector.load %arg25[%c0_9, %c0_10] : memref<1x64xf32, #tpu.memory_space<vmem>>, vector<1x64xf32>
      %25 = vector.broadcast %24 : vector<1x64xf32> to vector<8x64xf32>
      %26 = arith.mulf %23, %25 : vector<8x64xf32>
      %c0_11 = arith.constant 0 : index
      %c0_12 = arith.constant 0 : index
      %27 = vector.load %arg26[%c0_11, %c0_12] : memref<1x64xf32, #tpu.memory_space<vmem>>, vector<1x64xf32>
      %28 = vector.broadcast %27 : vector<1x64xf32> to vector<8x64xf32>
      %29 = arith.addf %26, %28 : vector<8x64xf32>
      %cst = arith.constant 0.000000e+00 : f32
      %30 = vector.broadcast %cst : f32 to vector<8x64xf32>
      %31 = arith.maximumf %29, %30 : vector<8x64xf32>
      %c0_13 = arith.constant 0 : index
      %c0_14 = arith.constant 0 : index
      %32 = vector.load %arg9[%c0_13, %c0_14] : memref<64x32xf32, #tpu.memory_space<vmem>>, vector<64x32xf32>
      %cst_15 = arith.constant dense<0.000000e+00> : vector<8x32xf32>
      %33 = tpu.matmul %31, %32, %cst_15 {dimension_numbers = #tpu.dot_dimension_numbers<[1], [0], [0], [1], [0, 0, 1, 1], [], []>} : vector<8x64xf32>, vector<64x32xf32>, vector<8x32xf32> -> vector<8x32xf32>
      %34 = arith.index_cast %1 : i32 to index
      %c0_16 = arith.constant 0 : index
      %35 = vector.load %arg15[%34, %c0_16] : memref<8x32xf32, #tpu.memory_space<vmem>>, vector<8x32xf32>
      tpu.vector_store %arg15[%34, %c0_16], %33 {strides = array<i32>} : memref<8x32xf32, #tpu.memory_space<vmem>>, vector<8x32xf32>,
      %c0_17 = arith.constant 0 : index
      %c0_18 = arith.constant 0 : index
      %36 = vector.load %arg21[%c0_17, %c0_18] : memref<1x32xf32, #tpu.memory_space<vmem>>, vector<1x32xf32>
      %cst_19 = arith.constant dense<0.000000e+00> : vector<32xf32>
      %37 = vector.multi_reduction <add>, %33, %cst_19 [0] : vector<8x32xf32> to vector<32xf32>
      %38 = vector.shape_cast %37 : vector<32xf32> to vector<1x32xf32>
      %39 = arith.addf %36, %38 : vector<1x32xf32>
      %c0_20 = arith.constant 0 : index
      %c0_21 = arith.constant 0 : index
      %40 = vector.load %arg21[%c0_20, %c0_21] : memref<1x32xf32, #tpu.memory_space<vmem>>, vector<1x32xf32>
      tpu.vector_store %arg21[%c0_20, %c0_21], %39 {strides = array<i32>} : memref<1x32xf32, #tpu.memory_space<vmem>>, vector<1x32xf32>,
      %c0_22 = arith.constant 0 : index
      %c0_23 = arith.constant 0 : index
      %41 = vector.load %arg22[%c0_22, %c0_23] : memref<1x32xf32, #tpu.memory_space<vmem>>, vector<1x32xf32>
      %42 = arith.mulf %33, %33 : vector<8x32xf32>
      %cst_24 = arith.constant dense<0.000000e+00> : vector<32xf32>
      %43 = vector.multi_reduction <add>, %42, %cst_24 [0] : vector<8x32xf32> to vector<32xf32>
      %44 = vector.shape_cast %43 : vector<32xf32> to vector<1x32xf32>
      %45 = arith.addf %41, %44 : vector<1x32xf32>
      %c0_25 = arith.constant 0 : index
      %c0_26 = arith.constant 0 : index
      %46 = vector.load %arg22[%c0_25, %c0_26] : memref<1x32xf32, #tpu.memory_space<vmem>>, vector<1x32xf32>
      tpu.vector_store %arg22[%c0_25, %c0_26], %45 {strides = array<i32>} : memref<1x32xf32, #tpu.memory_space<vmem>>, vector<1x32xf32>,
    } else {
    }
    %c3_i32 = arith.constant 3 : i32
    %16 = arith.cmpi eq, %arg0, %c3_i32 : i32
    %17 = arith.extui %16 : i1 to i32
    %c0_i32_6 = arith.constant 0 : i32
    %18 = arith.cmpi ne, %17, %c0_i32_6 : i32
    scf.if %18 {
      %c0_i32_7 = arith.constant 0 : i32
      %19 = arith.cmpi eq, %arg1, %c0_i32_7 : i32
      %20 = arith.extui %19 : i1 to i32
      %c0_i32_8 = arith.constant 0 : i32
      %21 = arith.cmpi ne, %20, %c0_i32_8 : i32
      scf.if %21 {
        %c0_20 = arith.constant 0 : index
        %c0_21 = arith.constant 0 : index
        %38 = vector.load %arg21[%c0_20, %c0_21] : memref<1x32xf32, #tpu.memory_space<vmem>>, vector<1x32xf32>
        %cst_22 = arith.constant 1.250000e-01 : f32
        %39 = vector.broadcast %cst_22 : f32 to vector<1x32xf32>
        %40 = arith.mulf %38, %39 : vector<1x32xf32>
        %c0_23 = arith.constant 0 : index
        %c0_24 = arith.constant 0 : index
        %41 = vector.load %arg22[%c0_23, %c0_24] : memref<1x32xf32, #tpu.memory_space<vmem>>, vector<1x32xf32>
        %cst_25 = arith.constant 1.250000e-01 : f32
        %42 = vector.broadcast %cst_25 : f32 to vector<1x32xf32>
        %43 = arith.mulf %41, %42 : vector<1x32xf32>
        %44 = arith.mulf %40, %40 : vector<1x32xf32>
        %45 = arith.subf %43, %44 : vector<1x32xf32>
        %cst_26 = arith.constant 0.000000e+00 : f32
        %46 = vector.broadcast %cst_26 : f32 to vector<1x32xf32>
        %47 = arith.maximumf %45, %46 : vector<1x32xf32>
        %c0_27 = arith.constant 0 : index
        %c0_28 = arith.constant 0 : index
        %48 = vector.load %arg10[%c0_27, %c0_28] : memref<1x32xf32, #tpu.memory_space<vmem>>, vector<1x32xf32>
        %cst_29 = arith.constant 9.99999974E-6 : f32
        %49 = vector.broadcast %cst_29 : f32 to vector<1x32xf32>
        %50 = arith.addf %47, %49 : vector<1x32xf32>
        %51 = math.rsqrt %50 : vector<1x32xf32>
        %52 = arith.mulf %48, %51 : vector<1x32xf32>
        %c0_30 = arith.constant 0 : index
        %c0_31 = arith.constant 0 : index
        %53 = vector.load %arg11[%c0_30, %c0_31] : memref<1x32xf32, #tpu.memory_space<vmem>>, vector<1x32xf32>
        %54 = arith.mulf %40, %52 : vector<1x32xf32>
        %55 = arith.subf %53, %54 : vector<1x32xf32>
        %c0_32 = arith.constant 0 : index
        %c0_33 = arith.constant 0 : index
        %56 = vector.load %arg27[%c0_32, %c0_33] : memref<1x32xf32, #tpu.memory_space<vmem>>, vector<1x32xf32>
        tpu.vector_store %arg27[%c0_32, %c0_33], %52 {strides = array<i32>} : memref<1x32xf32, #tpu.memory_space<vmem>>, vector<1x32xf32>,
        %c0_34 = arith.constant 0 : index
        %c0_35 = arith.constant 0 : index
        %57 = vector.load %arg28[%c0_34, %c0_35] : memref<1x32xf32, #tpu.memory_space<vmem>>, vector<1x32xf32>
        tpu.vector_store %arg28[%c0_34, %c0_35], %55 {strides = array<i32>} : memref<1x32xf32, #tpu.memory_space<vmem>>, vector<1x32xf32>,
      } else {
      }
      %22 = arith.index_cast %1 : i32 to index
      %c0 = arith.constant 0 : index
      %23 = vector.load %arg15[%22, %c0] : memref<8x32xf32, #tpu.memory_space<vmem>>, vector<8x32xf32>
      %c0_9 = arith.constant 0 : index
      %c0_10 = arith.constant 0 : index
      %24 = vector.load %arg27[%c0_9, %c0_10] : memref<1x32xf32, #tpu.memory_space<vmem>>, vector<1x32xf32>
      %25 = vector.broadcast %24 : vector<1x32xf32> to vector<8x32xf32>
      %26 = arith.mulf %23, %25 : vector<8x32xf32>
      %c0_11 = arith.constant 0 : index
      %c0_12 = arith.constant 0 : index
      %27 = vector.load %arg28[%c0_11, %c0_12] : memref<1x32xf32, #tpu.memory_space<vmem>>, vector<1x32xf32>
      %28 = vector.broadcast %27 : vector<1x32xf32> to vector<8x32xf32>
      %29 = arith.addf %26, %28 : vector<8x32xf32>
      %cst = arith.constant 0.000000e+00 : f32
      %30 = vector.broadcast %cst : f32 to vector<8x32xf32>
      %31 = arith.maximumf %29, %30 : vector<8x32xf32>
      %c0_13 = arith.constant 0 : index
      %c0_14 = arith.constant 0 : index
      %32 = vector.load %arg12[%c0_13, %c0_14] : memref<32x2xf32, #tpu.memory_space<vmem>>, vector<32x2xf32>
      %cst_15 = arith.constant dense<0.000000e+00> : vector<8x2xf32>
      %33 = tpu.matmul %31, %32, %cst_15 {dimension_numbers = #tpu.dot_dimension_numbers<[1], [0], [0], [1], [0, 0, 1, 1], [], []>} : vector<8x32xf32>, vector<32x2xf32>, vector<8x2xf32> -> vector<8x2xf32>
      %c0_16 = arith.constant 0 : index
      %c0_17 = arith.constant 0 : index
      %34 = vector.load %arg13[%c0_16, %c0_17] : memref<1x2xf32, #tpu.memory_space<vmem>>, vector<1x2xf32>
      %35 = vector.broadcast %34 : vector<1x2xf32> to vector<8x2xf32>
      %36 = arith.addf %33, %35 : vector<8x2xf32>
      %c0_18 = arith.constant 0 : index
      %c0_19 = arith.constant 0 : index
      %37 = vector.load %arg14[%c0_18, %c0_19] : memref<8x2xf32, #tpu.memory_space<vmem>>, vector<8x2xf32>
      tpu.vector_store %arg14[%c0_18, %c0_19], %36 {strides = array<i32>} : memref<8x2xf32, #tpu.memory_space<vmem>>, vector<8x2xf32>,
    } else {
    }
    return
  }
  func.func @transform_0(%arg0: i32, %arg1: i32) -> (i32, i32) {
    %c0_i32 = arith.constant 0 : i32
    %0 = arith.cmpi eq, %arg0, %c0_i32 : i32
    %c0_i32_0 = arith.constant 0 : i32
    %1 = arith.select %0, %arg1, %c0_i32_0 : i32
    %c0_i32_1 = arith.constant 0 : i32
    %c0_i32_2 = arith.constant 0 : i32
    return %1, %c0_i32_1 : i32, i32
  }
  func.func @transform_1(%arg0: i32, %arg1: i32) -> (i32, i32) {
    %c0_i32 = arith.constant 0 : i32
    %c0_i32_0 = arith.constant 0 : i32
    %c0_i32_1 = arith.constant 0 : i32
    return %c0_i32, %c0_i32_0 : i32, i32
  }
  func.func @transform_2(%arg0: i32, %arg1: i32) -> (i32, i32) {
    %c0_i32 = arith.constant 0 : i32
    %c0_i32_0 = arith.constant 0 : i32
    %c0_i32_1 = arith.constant 0 : i32
    return %c0_i32, %c0_i32_0 : i32, i32
  }
  func.func @transform_3(%arg0: i32, %arg1: i32) -> (i32, i32) {
    %c0_i32 = arith.constant 0 : i32
    %c0_i32_0 = arith.constant 0 : i32
    %c0_i32_1 = arith.constant 0 : i32
    return %c0_i32, %c0_i32_0 : i32, i32
  }
  func.func @transform_4(%arg0: i32, %arg1: i32) -> (i32, i32) {
    %c0_i32 = arith.constant 0 : i32
    %c0_i32_0 = arith.constant 0 : i32
    %c0_i32_1 = arith.constant 0 : i32
    return %c0_i32, %c0_i32_0 : i32, i32
  }
  func.func @transform_5(%arg0: i32, %arg1: i32) -> (i32, i32) {
    %c0_i32 = arith.constant 0 : i32
    %c0_i32_0 = arith.constant 0 : i32
    %c0_i32_1 = arith.constant 0 : i32
    return %c0_i32, %c0_i32_0 : i32, i32
  }
  func.func @transform_6(%arg0: i32, %arg1: i32) -> (i32, i32) {
    %c0_i32 = arith.constant 0 : i32
    %c0_i32_0 = arith.constant 0 : i32
    %c0_i32_1 = arith.constant 0 : i32
    return %c0_i32, %c0_i32_0 : i32, i32
  }
  func.func @transform_7(%arg0: i32, %arg1: i32) -> (i32, i32) {
    %c0_i32 = arith.constant 0 : i32
    %c0_i32_0 = arith.constant 0 : i32
    %c0_i32_1 = arith.constant 0 : i32
    return %c0_i32, %c0_i32_0 : i32, i32
  }
  func.func @transform_8(%arg0: i32, %arg1: i32) -> (i32, i32) {
    %c0_i32 = arith.constant 0 : i32
    %c0_i32_0 = arith.constant 0 : i32
    %c0_i32_1 = arith.constant 0 : i32
    return %c0_i32, %c0_i32_0 : i32, i32
  }
  func.func @transform_9(%arg0: i32, %arg1: i32) -> (i32, i32) {
    %c0_i32 = arith.constant 0 : i32
    %c0_i32_0 = arith.constant 0 : i32
    %c0_i32_1 = arith.constant 0 : i32
    return %c0_i32, %c0_i32_0 : i32, i32
  }
  func.func @transform_10(%arg0: i32, %arg1: i32) -> (i32, i32) {
    %c0_i32 = arith.constant 0 : i32
    %c0_i32_0 = arith.constant 0 : i32
    %c0_i32_1 = arith.constant 0 : i32
    return %c0_i32, %c0_i32_0 : i32, i32
  }
  func.func @transform_11(%arg0: i32, %arg1: i32) -> (i32, i32) {
    %c0_i32 = arith.constant 0 : i32
    %c0_i32_0 = arith.constant 0 : i32
    %c0_i32_1 = arith.constant 0 : i32
    return %c0_i32, %c0_i32_0 : i32, i32
  }
  func.func @transform_12(%arg0: i32, %arg1: i32) -> (i32, i32) {
    %c3_i32 = arith.constant 3 : i32
    %0 = arith.cmpi eq, %arg0, %c3_i32 : i32
    %c0_i32 = arith.constant 0 : i32
    %1 = arith.select %0, %arg1, %c0_i32 : i32
    %c0_i32_0 = arith.constant 0 : i32
    %c0_i32_1 = arith.constant 0 : i32
    return %1, %c0_i32_0 : i32, i32
  }
}

</mosaic_0001>

<bundles_post_ra>
// kernel: tpu_custom_call.1
= control target key start
LH: loop header
LB: loop body
LE: loop exit
PB: predicated region body
PF: predicated region fallthrough
CT: control target
= control target key end

     0   :  { %s1305_s21 = smov 0   ;;  %s1307_s22 = smov 0   ;;  %s1420_s0 = inlined_call_operand.vmem [shape: f32[8,16], index: 0, kind: input, shape index: {}]   ;;  %s1421_s1 = inlined_call_operand.vmem [shape: f32[16,32], index: 1, kind: input, shape index: {}]   ;;  %s1422_s2 = inlined_call_operand.vmem [shape: f32[1,32], index: 2, kind: input, shape index: {}]   ;;  %s1423_s3 = inlined_call_operand.vmem [shape: f32[1,32], index: 3, kind: input, shape index: {}]   ;;  %s1424_s4 = inlined_call_operand.vmem [shape: f32[32,64], index: 4, kind: input, shape index: {}]   ;;  %s1425_s5 = inlined_call_operand.vmem [shape: f32[1,64], index: 5, kind: input, shape index: {}]   ;;  %s1426_s6 = inlined_call_operand.vmem [shape: f32[1,64], index: 6, kind: input, shape index: {}]   ;;  %s1427_s7 = inlined_call_operand.vmem [shape: f32[64,32], index: 7, kind: input, shape index: {}]   ;;  %s1428_s8 = inlined_call_operand.vmem [shape: f32[1,32], index: 8, kind: input, shape index: {}]   ;;  %s1429_s9 = inlined_call_operand.vmem [shape: f32[1,32], index: 9, kind: input, shape index: {}]   ;;  %s1430_s10 = inlined_call_operand.vmem [shape: f32[32,2], index: 10, kind: input, shape index: {}]   ;;  %s1431_s11 = inlined_call_operand.vmem [shape: f32[1,2], index: 11, kind: input, shape index: {}]   ;;  %s1432_s12 = inlined_call_operand.vmem [shape: f32[8,2], index: 12, kind: output, shape index: {}]  }
   0x1   :  { %s1309_s23 = smov 0  }
   0x2 LB: > { %s34_s24 = sadd.s32 1, %s1225_s22  ;;  %p1076_p0 = scmp.ge.s32.totalorder %s1229_s23, 1  ;;  %s1229_s23 = sphi %s1309_s23, %s22_s23   ;;  %s1225_s22 = sphi %s1307_s22, %s1434_s22   ;;  %s1221_s21 = sphi %s1305_s21, %s1433_s21  }
   0x3   : > { %p36_p1 = scmp.ge.s32.totalorder %s34_s24, 4  ;;  %p385_p2 = scmp.lt.s32.totalorder %s1229_s23, 5 }
   0x5   : > { %s1436_s24 = smov (%p36_p1, %s34_s24), 0  ;;  %p386_p3 = pnand %p1076_p0, %p385_p2 }
   0x6   : > { %p446_p4 = scmp.eq.s32.totalorder (!%p386_p3), %s1221_s21, 0 }
   0x7   : > { %389 = sbr.rel (%p386_p3) target bundleno = 1011 (0x3f3), region = 68 }
   0xc   : > { %451 = sbr.rel (!%p446_p4) target bundleno = 17 (0x11), region = 72  ;;  %vm452_vm0 = vcmask (%p446_p4), 253952   ;;  %vm455_vm1 = vcmask (%p446_p4), 516096   ;;  %v1231_v0 = vmov (%p446_p4), 0.0  }
   0xd   : > { %453 = vst.msk [vmem:[#allocation4] sm:$0x1] (%p446_p4), %vm452_vm0, %v1231_v0  ;;  %454 = vst.msk [vmem:[#allocation5] sm:$0x1] (%p446_p4), %vm452_vm0, %v1231_v0 }
   0xe   : > { %458 = vst.msk [vmem:[#allocation8] sm:$0x1] (%p446_p4), %vm452_vm0, %v1231_v0  ;;  %459 = vst.msk [vmem:[#allocation9] sm:$0x1] (%p446_p4), %vm452_vm0, %v1231_v0 }
   0xf   : > { %456 = vst.msk [vmem:[#allocation6] sm:$0x1] (%p446_p4), %vm455_vm1, %v1231_v0  ;;  %457 = vst.msk [vmem:[#allocation7] sm:$0x1] (%p446_p4), %vm455_vm1, %v1231_v0 }
  0x11 PF: > { %p1078_p5 = scmp.ne.s32.totalorder %s1221_s21, 0 }
  0x13   : > { %462 = sbr.rel (%p1078_p5) target bundleno = 240 (0xf0), region = 76 }
  0x18   : > { %v465_v1 = vld [vmem:[%s1421_s1 + $0x8] sm:$0xff]  ;;  %v1232_v2 = vmov 0.0   ;;  %v464_v3 = vld [vmem:[%s1421_s1] sm:$0xff]  ;;  %vm1233_vm2 = vmmov 0   ;;  %vm466_vm3 = vcmask 130048   ;;  %vm541_vm4 = vcmask 261120  }
  0x19   : > { %1120 = vmatprep.subr.mxu0 %v1232_v2  ;;  %1124 = vmatprep.mubr.msk.f32.mxu0 %vm1233_vm2, %v1232_v2  ;;  %v463_v4 = vld [vmem:[%s1420_s0] sm:$0xff]  ;;  %v543_v19 = vld [vmem:[#allocation4] sm:$0x1]  ;;  %vm552_vm5 = vcmask 253952   ;;  %v554_v22 = vld [vmem:[#allocation5] sm:$0x1] }
  0x1a   : > { %1121 = vmatpush3.msra.mxu0 %v465_v1 }
  0x1b   : > { %1122 = vmatprep.subr.mxu0 %v1232_v2 }
  0x1c   : > { %1123 = vmatpush3.msra.mxu0 %v464_v3 }
  0x1d   : > { %1125 = vmatmul.mubr.msk.f32.vlgmr.msra.gmra.mxu0 %vm466_vm3, %v463_v4 }
  0xdd   : > { %v536_v5 = vpop.f32.mrf.mxu0 }
  0xde   : > { %542 = vst.msk [vmem:[#allocation2] sm:$0xff] %vm541_vm4, %v536_v5  ;;  %v544_v6 = vsel %vm541_vm4, %v536_v5, 0.0  ;;  %v555_v7 = vmul.f32 %v536_v5, %v536_v5 }
  0xdf   : > { %v545_v8 = vrot.slane %v544_v6, 4  ;;  %v1126_v9 = vpop.f32.mrf.mxu0 }
  0xe0   : > { %v556_v10 = vsel %vm541_vm4, %v555_v7, 0.0 }
  0xe1   : > { %v546_v11 = vadd.f32 %v545_v8, %v544_v6  ;;  %v557_v12 = vrot.slane %v556_v10, 4 }
  0xe3   : > { %v547_v13 = vrot.slane %v546_v11, 2  ;;  %v558_v14 = vadd.f32 %v557_v12, %v556_v10 }
  0xe5   : > { %v548_v15 = vadd.f32 %v547_v13, %v546_v11  ;;  %v559_v16 = vrot.slane %v558_v14, 2 }
  0xe7   : > { %v549_v17 = vrot.slane %v548_v15, 1  ;;  %v560_v18 = vadd.f32 %v559_v16, %v558_v14 }
  0xe9   : > { %v550_v20 = vadd.f32 %v549_v17, %v548_v15  ;;  %v561_v21 = vrot.slane %v560_v18, 1 }
  0xeb   : > { %v551_v23 = vadd.f32 %v550_v20, %v543_v19  ;;  %v562_v24 = vadd.f32 %v561_v21, %v560_v18 }
  0xed   : > { %553 = vst.msk [vmem:[#allocation4] sm:$0x1] %vm552_vm5, %v551_v23  ;;  %v563_v25 = vadd.f32 %v562_v24, %v554_v22 }
  0xef   : > { %564 = vst.msk [vmem:[#allocation5] sm:$0x1] %vm552_vm5, %v563_v25 }
  0xf0 PF: > { %p1080_p6 = scmp.ne.s32.totalorder %s1221_s21, 1 }
  0xf2   : > { %568 = sbr.rel (%p1080_p6) target bundleno = 502 (0x1f6), region = 80 }
  0xf7   : > { %v611_v26 = vld [vmem:[%s1424_s4 + $0x18] sm:$0xff]  ;;  %v1234_v27 = vmov 0.0   ;;  %v610_v28 = vld [vmem:[%s1424_s4 + $0x10] sm:$0xff]  ;;  %vm1235_vm6 = vmmov 0   ;;  %v609_v33 = vld [vmem:[%s1424_s4 + $0x8] sm:$0xff]  ;;  %vm586_vm7 = vcmask 253952  }
  0xf8   : > { %1127 = vmatprep.subr.mxu0 %v1234_v27  ;;  %1135 = vmatprep.mubr.msk.f32.mxu0 %vm1235_vm6, %v1234_v27  ;;  %v572_v29 = vld [vmem:[#allocation4] sm:$0x1]  ;;  %v574_v30 = vld [vmem:[#allocation5] sm:$0x1]  ;;  %v608_v35 = vld [vmem:[%s1424_s4] sm:$0xff]  ;;  %vm612_vm8 = vcmask 261120  }
  0xf9   : > { %1128 = vmatpush3.msra.mxu0 %v611_v26  ;;  %v573_v31 = vmul.f32 0.125, %v572_v29  ;;  %v575_v32 = vmul.f32 0.125, %v574_v30  ;;  %v579_v39 = vld [vmem:[%s1422_s2] sm:$0x1]  ;;  %vm687_vm9 = vcmask 523264   ;;  %vm698_vm10 = vcmask 516096  }
  0xfa   : > { %1129 = vmatprep.subr.mxu0 %v1234_v27  ;;  %v583_v42 = vld [vmem:[%s1423_s3] sm:$0x1]  ;;  %v689_v1 = vld [vmem:[#allocation6] sm:$0x1]  ;;  %v700_v4 = vld [vmem:[#allocation7] sm:$0x1] }
  0xfb   : > { %1130 = vmatpush3.msra.mxu0 %v610_v28  ;;  %v576_v34 = vmul.f32 %v573_v31, %v573_v31  ;;  %v590_v45 = vld [vmem:[#allocation2] sm:$0xff] }
  0xfc   : > { %1131 = vmatprep.subr.mxu0 %v1234_v27 }
  0xfd   : > { %1132 = vmatpush3.msra.mxu0 %v609_v33  ;;  %v577_v36 = vsub.f32 %v575_v32, %v576_v34 }
  0xfe   : > { %1133 = vmatprep.subr.mxu0 %v1234_v27 }
  0xff   : > { %1134 = vmatpush3.msra.mxu0 %v608_v35  ;;  %v578_v37 = vmax.f32 %v577_v36, 0.0 }
 0x101   : > { %v580_v38 = vadd.f32 1e-05, %v578_v37 }
 0x103   : > { %1201 = vrsqrt.f32 %v580_v38 }
 0x110   : > { %v1202_v40 = vpop.eup %1201 }
 0x111   : > { %v582_v41 = vmul.f32 %v1202_v40, %v579_v39 }
 0x113   : > { %v584_v43 = vmul.f32 %v582_v41, %v573_v31  ;;  %587 = vst.msk [vmem:[#allocation10] sm:$0x1] %vm586_vm7, %v582_v41 }
 0x115   : > { %v585_v44 = vsub.f32 %v583_v42, %v584_v43 }
 0x117   : > { %588 = vst.msk [vmem:[#allocation11] sm:$0x1] %vm586_vm7, %v585_v44 }
 0x11a   : > { %v1081_v46 = vld [vmem:[#allocation10] ss:$0 sm:$0xff] }
 0x11b   : > { %v598_v47 = vmul.f32 %v1081_v46, %v590_v45 }
 0x11e   : > { %v1082_v48 = vld [vmem:[#allocation11] ss:$0 sm:$0xff] }
 0x11f   : > { %v606_v49 = vadd.f32 %v1082_v48, %v598_v47 }
 0x121   : > { %v607_v50 = vmax.f32 %v606_v49, 0.0 }
 0x123   : > { %1136 = vmatmul.mubr.msk.f32.vlgmr.msra.gmra.mxu0 %vm612_vm8, %v607_v50 }
 0x1e3   : > { %v682_v51 = vpop.f32.mrf.mxu0 }
 0x1e4   : > { %688 = vst.msk [vmem:[#allocation3] sm:$0xff] %vm687_vm9, %v682_v51  ;;  %v690_v52 = vsel %vm687_vm9, %v682_v51, 0.0  ;;  %v701_v53 = vmul.f32 %v682_v51, %v682_v51 }
 0x1e5   : > { %v691_v54 = vrot.slane %v690_v52, 4  ;;  %v1137_v55 = vpop.f32.mrf.mxu0 }
 0x1e6   : > { %v702_v56 = vsel %vm687_vm9, %v701_v53, 0.0 }
 0x1e7   : > { %v692_v57 = vadd.f32 %v691_v54, %v690_v52  ;;  %v703_v58 = vrot.slane %v702_v56, 4 }
 0x1e9   : > { %v693_v59 = vrot.slane %v692_v57, 2  ;;  %v704_v60 = vadd.f32 %v703_v58, %v702_v56 }
 0x1eb   : > { %v694_v61 = vadd.f32 %v693_v59, %v692_v57  ;;  %v705_v62 = vrot.slane %v704_v60, 2 }
 0x1ed   : > { %v695_v63 = vrot.slane %v694_v61, 1  ;;  %v706_v0 = vadd.f32 %v705_v62, %v704_v60 }
 0x1ef   : > { %v696_v2 = vadd.f32 %v695_v63, %v694_v61  ;;  %v707_v3 = vrot.slane %v706_v0, 1 }
 0x1f1   : > { %v697_v5 = vadd.f32 %v696_v2, %v689_v1  ;;  %v708_v6 = vadd.f32 %v707_v3, %v706_v0 }
 0x1f3   : > { %699 = vst.msk [vmem:[#allocation6] sm:$0x1] %vm698_vm10, %v697_v5  ;;  %v709_v7 = vadd.f32 %v708_v6, %v700_v4 }
 0x1f5   : > { %710 = vst.msk [vmem:[#allocation7] sm:$0x1] %vm698_vm10, %v709_v7 }
 0x1f6 PF: > { %p1084_p7 = scmp.ne.s32.totalorder %s1221_s21, 2 }
 0x1f8   : > { %714 = sbr.rel (%p1084_p7) target bundleno = 764 (0x2fc), region = 88 }
 0x1fd   : > { %v761_v8 = vld [vmem:[%s1427_s7 + $0x38] sm:$0xff]  ;;  %v1236_v9 = vmov 0.0   ;;  %v760_v10 = vld [vmem:[%s1427_s7 + $0x30] sm:$0xff]  ;;  %vm1237_vm11 = vmmov 0   ;;  %v759_v12 = vld [vmem:[%s1427_s7 + $0x28] sm:$0xff]  ;;  %vm732_vm12 = vcmask 516096  }
 0x1fe   : > { %1138 = vmatprep.subr.mxu0 %v1236_v9  ;;  %1154 = vmatprep.mubr.msk.f32.mxu0 %vm1237_vm11, %v1236_v9  ;;  %v718_v11 = vld [vmem:[#allocation6] sm:$0x1]  ;;  %v720_v14 = vld [vmem:[#allocation7] sm:$0x1]  ;;  %v758_v16 = vld [vmem:[%s1427_s7 + $0x20] sm:$0xff]  ;;  %vm762_vm13 = vcmask 523264  }
 0x1ff   : > { %1139 = vmatpush3.msra.mxu0 %v761_v8  ;;  %v719_v13 = vmul.f32 0.125, %v718_v11  ;;  %v721_v15 = vmul.f32 0.125, %v720_v14  ;;  %v757_v18 = vld [vmem:[%s1427_s7 + $0x18] sm:$0xff]  ;;  %v756_v20 = vld [vmem:[%s1427_s7 + $0x10] sm:$0xff]  ;;  %v755_v22 = vld [vmem:[%s1427_s7 + $0x8] sm:$0xff]  ;;  %vm837_vm14 = vcmask 261120  }
 0x200   : > { %1140 = vmatprep.subr.mxu0 %v1236_v9  ;;  %v754_v24 = vld [vmem:[%s1427_s7] sm:$0xff]  ;;  %v736_v31 = vld [vmem:[#allocation3] sm:$0xff]  ;;  %v839_v51 = vld [vmem:[#allocation8] sm:$0x1]  ;;  %vm848_vm15 = vcmask 253952  }
 0x201   : > { %1141 = vmatpush3.msra.mxu0 %v760_v10  ;;  %v722_v17 = vmul.f32 %v719_v13, %v719_v13  ;;  %v725_v25 = vld [vmem:[%s1425_s5] sm:$0x1]  ;;  %v850_v54 = vld [vmem:[#allocation9] sm:$0x1] }
 0x202   : > { %1142 = vmatprep.subr.mxu0 %v1236_v9  ;;  %v729_v28 = vld [vmem:[%s1426_s6] sm:$0x1] }
 0x203   : > { %1143 = vmatpush3.msra.mxu0 %v759_v12  ;;  %v723_v19 = vsub.f32 %v721_v15, %v722_v17 }
 0x204   : > { %1144 = vmatprep.subr.mxu0 %v1236_v9 }
 0x205   : > { %1145 = vmatpush3.msra.mxu0 %v758_v16  ;;  %v724_v21 = vmax.f32 %v723_v19, 0.0 }
 0x206   : > { %1146 = vmatprep.subr.mxu0 %v1236_v9 }
 0x207   : > { %1147 = vmatpush3.msra.mxu0 %v757_v18  ;;  %v726_v23 = vadd.f32 1e-05, %v724_v21 }
 0x208   : > { %1148 = vmatprep.subr.mxu0 %v1236_v9 }
 0x209   : > { %1149 = vmatpush3.msra.mxu0 %v756_v20  ;;  %1203 = vrsqrt.f32 %v726_v23 }
 0x20a   : > { %1150 = vmatprep.subr.mxu0 %v1236_v9 }
 0x20b   : > { %1151 = vmatpush3.msra.mxu0 %v755_v22 }
 0x20c   : > { %1152 = vmatprep.subr.mxu0 %v1236_v9 }
 0x20d   : > { %1153 = vmatpush3.msra.mxu0 %v754_v24 }
 0x216   : > { %v1204_v26 = vpop.eup %1203 }
 0x217   : > { %v728_v27 = vmul.f32 %v1204_v26, %v725_v25 }
 0x219   : > { %v730_v29 = vmul.f32 %v728_v27, %v719_v13  ;;  %733 = vst.msk [vmem:[#allocation12] sm:$0x1] %vm732_vm12, %v728_v27 }
 0x21b   : > { %v731_v30 = vsub.f32 %v729_v28, %v730_v29 }
 0x21d   : > { %734 = vst.msk [vmem:[#allocation13] sm:$0x1] %vm732_vm12, %v731_v30 }
 0x220   : > { %v1085_v32 = vld [vmem:[#allocation12] ss:$0 sm:$0xff] }
 0x221   : > { %v744_v33 = vmul.f32 %v1085_v32, %v736_v31 }
 0x224   : > { %v1086_v34 = vld [vmem:[#allocation13] ss:$0 sm:$0xff] }
 0x225   : > { %v752_v35 = vadd.f32 %v1086_v34, %v744_v33 }
 0x227   : > { %v753_v36 = vmax.f32 %v752_v35, 0.0 }
 0x229   : > { %1155 = vmatmul.mubr.msk.f32.vlgmr.msra.gmra.mxu0 %vm762_vm13, %v753_v36 }
 0x2e9   : > { %v832_v37 = vpop.f32.mrf.mxu0 }
 0x2ea   : > { %838 = vst.msk [vmem:[#allocation2] sm:$0xff] %vm837_vm14, %v832_v37  ;;  %v840_v38 = vsel %vm837_vm14, %v832_v37, 0.0  ;;  %v851_v39 = vmul.f32 %v832_v37, %v832_v37 }
 0x2eb   : > { %v841_v40 = vrot.slane %v840_v38, 4  ;;  %v1156_v41 = vpop.f32.mrf.mxu0 }
 0x2ec   : > { %v852_v42 = vsel %vm837_vm14, %v851_v39, 0.0 }
 0x2ed   : > { %v842_v43 = vadd.f32 %v841_v40, %v840_v38  ;;  %v853_v44 = vrot.slane %v852_v42, 4 }
 0x2ef   : > { %v843_v45 = vrot.slane %v842_v43, 2  ;;  %v854_v46 = vadd.f32 %v853_v44, %v852_v42 }
 0x2f1   : > { %v844_v47 = vadd.f32 %v843_v45, %v842_v43  ;;  %v855_v48 = vrot.slane %v854_v46, 2 }
 0x2f3   : > { %v845_v49 = vrot.slane %v844_v47, 1  ;;  %v856_v50 = vadd.f32 %v855_v48, %v854_v46 }
 0x2f5   : > { %v846_v52 = vadd.f32 %v845_v49, %v844_v47  ;;  %v857_v53 = vrot.slane %v856_v50, 1 }
 0x2f7   : > { %v847_v55 = vadd.f32 %v846_v52, %v839_v51  ;;  %v858_v56 = vadd.f32 %v857_v53, %v856_v50 }
 0x2f9   : > { %849 = vst.msk [vmem:[#allocation8] sm:$0x1] %vm848_vm15, %v847_v55  ;;  %v859_v57 = vadd.f32 %v858_v56, %v850_v54 }
 0x2fb   : > { %860 = vst.msk [vmem:[#allocation9] sm:$0x1] %vm848_vm15, %v859_v57 }
 0x2fc PF: > { %p1088_p8 = scmp.ne.s32.totalorder %s1221_s21, 3 }
 0x2fe   : > { %864 = sbr.rel (%p1088_p8) target bundleno = 1011 (0x3f3), region = 96 }
 0x303   : > { %v907_v58 = vld [vmem:[%s1430_s10 + $0x18] sm:$0xff]  ;;  %v1238_v59 = vmov 0.0   ;;  %v906_v60 = vld [vmem:[%s1430_s10 + $0x10] sm:$0xff]  ;;  %vm1239_vm0 = vmmov 0   ;;  %v905_v1 = vld [vmem:[%s1430_s10 + $0x8] sm:$0xff]  ;;  %vm882_vm1 = vcmask 253952  }
 0x304   : > { %1157 = vmatprep.subr.mxu0 %v1238_v59  ;;  %1165 = vmatprep.mubr.msk.f32.mxu0 %vm1239_vm0, %v1238_v59  ;;  %v868_v61 = vld [vmem:[#allocation8] sm:$0x1]  ;;  %v870_v62 = vld [vmem:[#allocation9] sm:$0x1]  ;;  %v904_v3 = vld [vmem:[%s1430_s10] sm:$0xff]  ;;  %vm915_vm2 = vcmask 261120  }
 0x305   : > { %1158 = vmatpush3.msra.mxu0 %v907_v58  ;;  %v869_v63 = vmul.f32 0.125, %v868_v61  ;;  %v871_v0 = vmul.f32 0.125, %v870_v62  ;;  %v875_v7 = vld [vmem:[%s1428_s8] sm:$0x1]  ;;  %vm989_vm3 = vcmask 15360  }
 0x306   : > { %1159 = vmatprep.subr.mxu0 %v1238_v59  ;;  %v879_v10 = vld [vmem:[%s1429_s9] sm:$0x1] }
 0x307   : > { %1160 = vmatpush3.msra.mxu0 %v906_v60  ;;  %v872_v2 = vmul.f32 %v869_v63, %v869_v63  ;;  %v886_v13 = vld [vmem:[#allocation2] sm:$0xff] }
 0x308   : > { %1161 = vmatprep.subr.mxu0 %v1238_v59  ;;  %v1091_v19 = vld [vmem:[%s1431_s11] ss:$0 sm:$0xff] }
 0x309   : > { %1162 = vmatpush3.msra.mxu0 %v905_v1  ;;  %v873_v4 = vsub.f32 %v871_v0, %v872_v2 }
 0x30a   : > { %1163 = vmatprep.subr.mxu0 %v1238_v59 }
 0x30b   : > { %1164 = vmatpush3.msra.mxu0 %v904_v3  ;;  %v874_v5 = vmax.f32 %v873_v4, 0.0 }
 0x30d   : > { %v876_v6 = vadd.f32 1e-05, %v874_v5 }
 0x30f   : > { %1205 = vrsqrt.f32 %v876_v6 }
 0x31c   : > { %v1206_v8 = vpop.eup %1205 }
 0x31d   : > { %v878_v9 = vmul.f32 %v1206_v8, %v875_v7 }
 0x31f   : > { %v880_v11 = vmul.f32 %v878_v9, %v869_v63  ;;  %883 = vst.msk [vmem:[#allocation14] sm:$0x1] %vm882_vm1, %v878_v9 }
 0x321   : > { %v881_v12 = vsub.f32 %v879_v10, %v880_v11 }
 0x323   : > { %884 = vst.msk [vmem:[#allocation15] sm:$0x1] %vm882_vm1, %v881_v12 }
 0x326   : > { %v1089_v14 = vld [vmem:[#allocation14] ss:$0 sm:$0xff] }
 0x327   : > { %v894_v15 = vmul.f32 %v1089_v14, %v886_v13 }
 0x32a   : > { %v1090_v16 = vld [vmem:[#allocation15] ss:$0 sm:$0xff] }
 0x32b   : > { %v902_v17 = vadd.f32 %v1090_v16, %v894_v15 }
 0x32d   : > { %v903_v18 = vmax.f32 %v902_v17, 0.0 }
 0x32f   : > { %1166 = vmatmul.mubr.msk.f32.vlgmr.msra.gmra.mxu0 %vm915_vm2, %v903_v18 }
 0x3ef   : > { %v985_v20 = vpop.f32.mrf.mxu0 }
 0x3f0   : > { %v986_v21 = vadd.f32 %v1091_v19, %v985_v20 }
 0x3f1   : > { %v1167_v22 = vpop.f32.mrf.mxu0 }
 0x3f2   : > { %990 = vst.msk [vmem:[%s1432_s12] sm:$0xff] %vm989_vm3, %v986_v21 }
 0x3f3 PF: > { %s22_s23 = sadd.s32 1, %s1229_s23   ;;  %s1433_s21 = smov %s1225_s22 }
 0x3f4   : > { %p19_p9 = scmp.ge.s32.totalorder %s22_s23, 6   ;;  %s1434_s22 = smov %s1436_s24 }
 0x3f6   :  { %21 = sbr.rel (!%p19_p9) target bundleno = 2 (0x2), region = 136 }

</bundles_post_ra>
